<compile_context>
chip_gen: v7x
topology: tpu7x:2x2x1
jax: 0.10.0
libtpu: 0.0.40
codegen_flags: <defaults>
</compile_context>

<pallas_src>
import math

import jax
import jax.numpy as jnp
from jax.experimental import pallas as pl
from jax.experimental.pallas import tpu as pltpu

_LANE = 128
_SUBLANE = 8                      # f32 accumulator sublane granularity
_NUM_SHARDS = 2                   # leading "parallel" grid axis (v7x: 2 TCs)
_TARGET_BLOCK_BYTES = 4 * 1024 * 1024   # ~4 MiB grad_f block (2x buffered)
_MAX_LANE_WIDTH = 4096            # cap for the lcm(m*d, 128) lane layout


def _round_up(x, mult):
    return ((x + mult - 1) // mult) * mult


def _cdiv(a, b):
    return -(-a // b)


def _vmem_capacity_bytes():
    try:
        return int(pltpu.get_tpu_info().vmem_capacity_bytes)
    except Exception:
        return 64 * 1024 * 1024   # v7x-safe fallback


def _var_loss_kernel(g_ref, out_ref):
    """Accumulate per-(sublane-phase, lane) sums of grad^2.

    g_ref   : (tile_r, L)   VMEM tile of the flattened gradient slab
    out_ref : (8, L) f32    per-shard partial sums (revisited accumulator,
                            resident across the reduction axis)
    """
    s = pl.program_id(1)

    @pl.when(s == 0)
    def _init():
        out_ref[...] = jnp.zeros_like(out_ref)

    g = g_ref[...].astype(jnp.float32)          # (tile_r, L)
    g2 = g * g
    tile_r, lane = g2.shape
    # Reduce only over whole-vreg chunks (pure VPU adds). The sublane split is
    # aligned with the native (8, 128) f32 tiling, so the reshape is a view.
    out_ref[...] += jnp.sum(
        g2.reshape(tile_r // _SUBLANE, _SUBLANE, lane), axis=0)


def variational_loss(grad_f, beta):
    """loss = sum_i beta[i] * sum_{n,d} grad_f[n,i,d]^2 / N  (Pallas TPU)."""
    N, m, d = grad_f.shape
    md = m * d
    beta_f32 = beta.astype(jnp.float32)

    # ---- lane-dense layout (built wrapper-side) ----------------------------
    lcm = md * _LANE // math.gcd(md, _LANE)
    if lcm <= _MAX_LANE_WIDTH:
        # Fully flatten: L is a multiple of both 128 and m*d, so the beta
        # weight is constant down each lane (no padded lanes, no wasted DMA).
        L = lcm
        w_lane = jnp.tile(jnp.repeat(beta_f32, d), L // md)          # (L,)
        flat = grad_f.reshape(-1)                                    # (N*m*d,)
        total_rows = _cdiv(flat.shape[0], L)
        flat_mode = True
    else:
        # Rare fallback (huge/awkward m*d): keep (N, m*d) rows, pad lanes.
        L = _round_up(md, _LANE)
        w_lane = jnp.concatenate(
            [jnp.repeat(beta_f32, d), jnp.zeros((L - md,), jnp.float32)])
        total_rows = N
        flat_mode = False

    # ---- tile sizing / VMEM budget -----------------------------------------
    itemsize = jnp.dtype(grad_f.dtype).itemsize      # keep native dtype (bf16 ok)
    row_gran = {4: 8, 2: 16, 1: 32}.get(itemsize, 8)  # sublane multiple per dtype
    row_bytes = L * itemsize
    vmem_cap = _vmem_capacity_bytes()

    block_bytes = min(_TARGET_BLOCK_BYTES, vmem_cap // 8)
    tile_r = max(row_gran, (block_bytes // row_bytes) // row_gran * row_gran)

    rows_per_shard = _cdiv(total_rows, _NUM_SHARDS)
    tile_r = min(tile_r, _round_up(rows_per_shard, row_gran))
    steps = _cdiv(rows_per_shard, tile_r)
    rows_pad = _NUM_SHARDS * steps * tile_r

    if flat_mode:
        pad = rows_pad * L - flat.shape[0]
        if pad:
            flat = jnp.pad(flat, (0, pad))
        g2d = flat.reshape(rows_pad, L)
    else:
        g2d = grad_f.reshape(N, md)
        g2d = jnp.pad(g2d, ((0, rows_pad - N), (0, L - md)))
    # TODO(synk): remainder could be masked in-kernel instead of zero-padding
    # to avoid one extra HBM copy when shapes don't align.

    in_block_bytes = tile_r * L * itemsize
    out_block_bytes = _SUBLANE * L * 4
    vmem_need = 2 * in_block_bytes + 2 * out_block_bytes + (2 << 20)
    vmem_limit = int(max(vmem_need, min(64 << 20, vmem_cap) // 2))

    cost = pl.CostEstimate(
        flops=2 * rows_pad * L,
        transcendentals=0,
        bytes_accessed=rows_pad * L * itemsize + _NUM_SHARDS * out_block_bytes,
    )

    partials = pl.pallas_call(
        _var_loss_kernel,
        out_shape=jax.ShapeDtypeStruct((_NUM_SHARDS * _SUBLANE, L), jnp.float32),
        grid_spec=pltpu.PrefetchScalarGridSpec(
            num_scalar_prefetch=0,
            grid=(_NUM_SHARDS, steps),
            in_specs=[
                pl.BlockSpec((tile_r, L), lambda c, s: (c * steps + s, 0)),
            ],
            out_specs=pl.BlockSpec((_SUBLANE, L), lambda c, s: (c, 0)),
        ),
        compiler_params=pltpu.CompilerParams(
            dimension_semantics=("parallel", "arbitrary"),
            vmem_limit_bytes=vmem_limit,
        ),
        cost_estimate=cost,
    )(g2d)

    # Tiny finalize in the wrapper: cross-lane reduce + beta contraction + /N.
    per_lane = jnp.sum(partials, axis=0)              # (L,) f32
    return jnp.dot(w_lane, per_lane) / jnp.float32(N)


def variational_loss_ref(grad_f, beta):
    """Pure-JAX reference matching the PyTorch forward."""
    g = grad_f.astype(jnp.float32)
    return jnp.sum(
        beta.astype(jnp.float32) * jnp.sum(g * g, axis=(0, 2))) / grad_f.shape[0]


if __name__ == "__main__":
    key = jax.random.PRNGKey(0)
    k1, k2 = jax.random.split(key)

    # Shapes consistent with the module: N=8 points, m=4 eigenfunctions, d=16.
    N, m, d = 8, 4, 16
    grad_f = jax.random.normal(k1, (N, m, d), dtype=jnp.float32)
    beta = jnp.arange(1, m + 1, dtype=jnp.float32) / m

    loss = jax.block_until_ready(variational_loss(grad_f, beta))
    ref = variational_loss_ref(grad_f, beta)
    assert jnp.allclose(loss, ref, rtol=1e-5, atol=1e-5), (loss, ref)

    # Second sanity check: awkward m*d (flattened lane layout) + bf16 input.
    N2, m2, d2 = 40, 3, 10
    grad_f2 = jax.random.normal(k2, (N2, m2, d2), dtype=jnp.bfloat16)
    beta2 = jnp.linspace(0.5, 1.5, m2, dtype=jnp.float32)
    loss2 = jax.block_until_ready(variational_loss(grad_f2, beta2))
    ref2 = variational_loss_ref(grad_f2, beta2)
    assert jnp.allclose(loss2, ref2, rtol=1e-3, atol=1e-3), (loss2, ref2)

    print("KERNEL_OK")
</pallas_src>

<mosaic_0001>
module attributes {stable_mosaic.version = 11 : i64} {
  func.func @_var_loss_kernel(%arg0: i32, %arg1: i32, %arg2: memref<8x128xf32, #tpu.memory_space<vmem>>, %arg3: memref<8x128xf32, #tpu.memory_space<vmem>>) attributes {dimension_semantics = [#tpu.dimension_semantics<parallel>, #tpu.dimension_semantics<arbitrary>], iteration_bounds = array<i64: 2, 1>, scalar_prefetch = 0 : i64, scratch_operands = 0 : i64, tpu.core_type = #tpu.core_type<tc>, window_params = [{transform_indices = @transform_0, window_bounds = array<i64: 8, 128>}, {transform_indices = @transform_1, window_bounds = array<i64: 8, 128>}]} {
    %c0_i32 = arith.constant 0 : i32
    %0 = arith.cmpi eq, %arg1, %c0_i32 : i32
    %1 = arith.extui %0 : i1 to i32
    %c0_i32_0 = arith.constant 0 : i32
    %2 = arith.cmpi ne, %1, %c0_i32_0 : i32
    scf.if %2 {
      %cst_6 = arith.constant 0.000000e+00 : f32
      %10 = vector.broadcast %cst_6 : f32 to vector<8x128xf32>
      %c0_7 = arith.constant 0 : index
      %c0_8 = arith.constant 0 : index
      %11 = vector.load %arg3[%c0_7, %c0_8] : memref<8x128xf32, #tpu.memory_space<vmem>>, vector<8x128xf32>
      tpu.vector_store %arg3[%c0_7, %c0_8], %10 {strides = array<i32>} : memref<8x128xf32, #tpu.memory_space<vmem>>, vector<8x128xf32>,
    } else {
    }
    %c0 = arith.constant 0 : index
    %c0_1 = arith.constant 0 : index
    %3 = vector.load %arg2[%c0, %c0_1] : memref<8x128xf32, #tpu.memory_space<vmem>>, vector<8x128xf32>
    %4 = arith.mulf %3, %3 : vector<8x128xf32>
    %c0_2 = arith.constant 0 : index
    %c0_3 = arith.constant 0 : index
    %5 = vector.load %arg3[%c0_2, %c0_3] : memref<8x128xf32, #tpu.memory_space<vmem>>, vector<8x128xf32>
    %6 = vector.shape_cast %4 : vector<8x128xf32> to vector<1x8x128xf32>
    %cst = arith.constant dense<0.000000e+00> : vector<8x128xf32>
    %7 = vector.multi_reduction <add>, %6, %cst [0] : vector<1x8x128xf32> to vector<8x128xf32>
    %8 = arith.addf %5, %7 : vector<8x128xf32>
    %c0_4 = arith.constant 0 : index
    %c0_5 = arith.constant 0 : index
    %9 = vector.load %arg3[%c0_4, %c0_5] : memref<8x128xf32, #tpu.memory_space<vmem>>, vector<8x128xf32>
    tpu.vector_store %arg3[%c0_4, %c0_5], %8 {strides = array<i32>} : memref<8x128xf32, #tpu.memory_space<vmem>>, vector<8x128xf32>,
    return
  }
  func.func @transform_0(%arg0: i32, %arg1: i32) -> (i32, i32) {
    %c1_i32 = arith.constant 1 : i32
    %0 = arith.muli %arg0, %c1_i32 : i32
    %1 = arith.addi %0, %arg1 : i32
    %c0_i32 = arith.constant 0 : i32
    %c0_i32_0 = arith.constant 0 : i32
    return %1, %c0_i32 : i32, i32
  }
  func.func @transform_1(%arg0: i32, %arg1: i32) -> (i32, i32) {
    %c0_i32 = arith.constant 0 : i32
    %c0_i32_0 = arith.constant 0 : i32
    return %arg0, %c0_i32 : i32, i32
  }
}

</mosaic_0001>

<bundles_post_ra>
// kernel: tpu_custom_call.1
= control target key start
LH: loop header
LB: loop body
LE: loop exit
PB: predicated region body
PF: predicated region fallthrough
CT: control target
= control target key end

     0   :  { %6 = vsyncpa [#allocation3], 0  ;;  %s626_s0 = inlined_call_operand.hbm [shape: f32[16,128], index: 0, kind: input, shape index: {}]   ;;  %s627_s1 = inlined_call_operand.hbm [shape: f32[16,128], index: 1, kind: output, shape index: {}]  }
   0x1   :  { %8 = vsyncpa [#allocation3 + $0x1], 0 }
   0x2   :  { %9 = vsyncpa [#allocation4], 0 }
   0x3   :  { %11 = vsyncpa [#allocation4 + $0x1], 0  ;;  %s454_s6 = smov 0   ;;  %s456_s7 = smov 0  }
   0x4   :  { %s458_s8 = smov 0   ;;  %s460_s9 = smov 0  }
   0x5   :  { %s462_s10 = smov 0   ;;  %s464_s11 = smov 0  }
   0x6 LB: > { %s252_s12 = sadd.s32 4294967295, %s440_s11   ;;  %s253_s13 = sadd.s32 4294967294, %s440_s11   ;;  %s440_s11 = sphi %s464_s11, %s17_s11   ;;  %s436_s10 = sphi %s462_s10, %s643_s10   ;;  %s432_s9 = sphi %s460_s9, %s642_s9   ;;  %s428_s8 = sphi %s458_s8, %s641_s8   ;;  %s424_s7 = sphi %s456_s7, %s640_s7   ;;  %s420_s6 = sphi %s454_s6, %s639_s6  }
   0x7   : > { %s29_s14 = sadd.s32 1, %s436_s10  ;;  %s38_s15 = sadd.s32 1, %s428_s8 }
   0x8   : > { %p31_p0 = scmp.ge.s32.totalorder %s29_s14, 2  ;;  %p45_p1 = scmp.ne.s32.totalorder %s428_s8, %s424_s7 }
   0x9   : > { %p46_p2 = scmp.eq.s32.totalorder %s440_s11, 0  ;;  %p51_p3 = scmp.ne.s32.totalorder %s424_s7, %s420_s6 }
   0xa   : > { %s645_s14 = smov (%p31_p0, %s29_s14), 0  ;;  %p52_p5 = scmp.eq.s32.totalorder %s252_s12, 0 }
   0xb   : > { %p495_p4 = por %p46_p2, %p45_p1  ;;  %s35_s17 = ssub.s32 %s436_s10, %s645_s14 }
   0xc   : > { %p75_p6 = scmp.eq.s32.totalorder %s252_s12, 1  ;;  %p36_p7 = scmp.eq.s32.totalorder %s35_s17, 0 }
   0xd   : > { %p501_p8 = por %p52_p5, %p51_p3  ;;  %p81_p10 = scmp.eq.s32.totalorder %s253_s13, 1 }
   0xe   : > { %p505_p9 = por %p75_p6, %p45_p1  ;;  %p277_p13 = scmp.lt.s32.totalorder %s440_s11, 2 }
   0xf   : > { %s510_s20 = scalar_select %p36_p7, %s428_s8, %s38_s15  }
  0x10   : > { %s631_s19 = scalar_select %p505_p9, 1, 0 }
  0x11   : > { %p512_p11 = por %p81_p10, %p51_p3  ;;  %s101_s22 = sand.u32 1, %s428_s8  }
  0x12   : > { %s256_s23 = sshll.u32 %s101_s22, 3  ;;  %s257_s24 = sshll.u32 %s436_s10, 7 }
  0x13   : > { %s632_s21 = scalar_select %p512_p11, 1, 0 }
  0x14   : > { %s523_s27 = scalar_lea.hbm %s626_s0, %s257_s24  ;;  %s105_s28 = scalar_lea.vmem [#allocation2], %s256_s23 }
  0x15   : > { %s113_s29 = sshll.u32 %s105_s28, 4  ;;  %p529_p0 = pnand %p277_p13, %p495_p4  ;;  %s525_s29 = int_to_ptr.vmem [resolvable:$true] %s113_s29 }
  0x16   : > { %s102_s2 = scalar_lea.sflag [#allocation3], %s101_s22  ;;  %s328_s3 = scalar_lea.hbm %s523_s27, 128 }
  0x17   : > { %p329_p3 = scmp.ne.s32.totalorder %s523_s27, %s328_s3  ;;  %p330_p5 = pneg %p529_p0 }
  0x18   : > { %s333_s12 = scalar_lea.hbm %s626_s0, 256  ;;  %p334_p4 = scmp.lt.u32.totalorder %s523_s27, %s626_s0 }
  0x19   : > { %p331_p6 = pnand %p330_p5, %p329_p3  ;;  %p335_p10 = scmp.lt.u32.totalorder %s333_s12, %s328_s3 }
  0x1a   : > { %p337_p12 = scmp.lt.u32.totalorder %s328_s3, %s523_s27 }
  0x1b   : > { %p332_p7 = pneg %p331_p6  ;;  %p336_p13 = por %p335_p10, %p334_p4 }
  0x1d   : > { %p338_p1 = por %p337_p12, %p336_p13 }
  0x1f   : > { %p339_p2 = pnand %p338_p1, %p332_p7 }
  0x21   : > { %342 = shalt.err (!%p339_p2)
}
  0x22   : > { %s343_s16 = scalar_lea.vmem %s525_s29, 128  ;;  %s442_s17 = smov [#allocation2]  }
  0x23   : > { %p344_p3 = scmp.ne.s32.totalorder %s525_s29, %s343_s16  ;;  %s348_s22 = sshll.u32 %s442_s17, 4  ;;  %s349_s22 = int_to_ptr.vmem [resolvable:$false] %s348_s22 }
  0x24   : > { %s350_s23 = scalar_lea.vmem %s349_s22, 256  ;;  %p351_p9 = scmp.lt.s32.totalorder %s525_s29, %s349_s22 }
  0x25   : > { %p346_p6 = pnand %p344_p3, %p330_p5  ;;  %p352_p4 = scmp.lt.s32.totalorder %s350_s23, %s343_s16 }
  0x27   : > { %p347_p11 = pneg %p346_p6  ;;  %p353_p10 = por %p352_p4, %p351_p9 }
  0x29   : > { %p354_p12 = pnand %p353_p10, %p347_p11 }
  0x2b   : > { %357 = shalt.err (!%p354_p12)
}
  0x2c   : > { %272 = dma.hbm_to_vmem [thread:$0]  (!%p529_p0), %s523_s27, 128, %s525_s29, %s102_s2  }
  0x2d   : > { %p634_p1 = scmp.lt.s32.totalorder %s440_s11, 3  ;;  %p635_p2 = scmp.ge.s32.totalorder %s440_s11, 1 }
  0x2f   : > { %p119_p5 = pnand %p635_p2, %p634_p1 }
  0x30   : > { %s565_s24 = sand.u32 (!%p119_p5), 1, %s424_s7  }
  0x31   : > { %122 = sbr.rel (%p119_p5) target bundleno = 83 (0x53), region = 24  ;;  %s259_s25 = sshll.u32 (!%p119_p5), %s565_s24, 3 }
  0x32   : > { %s125_s26 = scalar_lea.sflag (!%p119_p5), [#allocation3], %s565_s24  ;;  %s128_s28 = scalar_lea.vmem (!%p119_p5), [#allocation2], %s259_s25 }
  0x38   : > { %411 = dma.done.wait (%p501_p8), %s125_s26, 128  }
  0x39   : > { %413 = vsyncadd (%p501_p8), %s125_s26, 4294967168  ;;  %v153_v0 = vld [vmem:[%s128_s28] sm:$0xff]  ;;  %s262_s27 = sshll.u32 %s432_s9, 7  ;;  %s146_s29 = scalar_lea.vmem [#allocation5], %s259_s25 }
  0x3a   : > { %s173_s30 = sshll.u32 %s146_s29, 4  ;;  %v154_v1 = vmul.f32 %v153_v0, %v153_v0  ;;  %s577_s4 = scalar_lea.hbm %s627_s1, %s262_s27  ;;  %s579_s30 = int_to_ptr.vmem [resolvable:$true] %s173_s30 }
  0x3b   : > { %s160_s18 = scalar_lea.sflag [#allocation4], %s565_s24  ;;  %s358_s5 = scalar_lea.vmem %s579_s30, 128 }
  0x3c   : > { %158 = vst [vmem:[%s146_s29] sm:$0xff] %v154_v1  ;;  %p359_p8 = scmp.ne.s32.totalorder %s579_s30, %s358_s5  ;;  %p636_p9 = scmp.ne.s32.totalorder %s631_s19, 0 }
  0x3d   : > { %s443_s9 = smov [#allocation5]  }
  0x3e   : > { %p360_p11 = pnand %p359_p8, %p636_p9  ;;  %s362_s12 = sshll.u32 %s443_s9, 4  ;;  %s363_s12 = int_to_ptr.vmem [resolvable:$false] %s362_s12 }
  0x3f   : > { %s364_s13 = scalar_lea.vmem %s363_s12, 256  ;;  %p365_p7 = scmp.lt.s32.totalorder %s579_s30, %s363_s12 }
  0x40   : > { %p361_p0 = pneg %p360_p11  ;;  %p366_p13 = scmp.lt.s32.totalorder %s364_s13, %s358_s5 }
  0x42   : > { %p367_p3 = por %p366_p13, %p365_p7 }
  0x44   : > { %p368_p6 = pnand %p367_p3, %p361_p0 }
  0x46   : > { %371 = shalt.err (!%p368_p6)
}
  0x47   : > { %s372_s15 = scalar_lea.hbm %s577_s4, 128  ;;  %s376_s22 = scalar_lea.hbm %s627_s1, 256 }
  0x48   : > { %p373_p4 = scmp.ne.s32.totalorder %s577_s4, %s372_s15  ;;  %p377_p1 = scmp.lt.u32.totalorder %s577_s4, %s627_s1 }
  0x49   : > { %p378_p2 = scmp.lt.u32.totalorder %s376_s22, %s372_s15  ;;  %p380_p8 = scmp.lt.u32.totalorder %s372_s15, %s577_s4 }
  0x4a   : > { %p374_p10 = pnand %p373_p4, %p636_p9 }
  0x4b   : > { %p379_p5 = por %p378_p2, %p377_p1 }
  0x4c   : > { %p375_p12 = pneg %p374_p10 }
  0x4d   : > { %p381_p11 = por %p380_p8, %p379_p5 }
  0x4f   : > { %p382_p0 = pnand %p381_p11, %p375_p12 }
  0x51   : > { %385 = shalt.err (!%p382_p0)
}
  0x52   : > { %267 = dma.vmem_to_hbm [thread:$0]  (%p636_p9), %s579_s30, 128, %s577_s4, %s160_s18  }
  0x53 PF: > { %s185_s25 = sand.u32 1, %s420_s6   ;;  %p637_p7 = scmp.ne.s32.totalorder %s632_s21, 0 }
  0x54   : > { %p638_p13 = scmp.ge.s32.totalorder %s440_s11, 2  ;;  %s186_s26 = scalar_lea.sflag [#allocation4], %s185_s25 }
  0x56   : > { %p274_p3 = pnand %p638_p13, %p637_p7 }
  0x58   : > { %415 = dma.done.wait (!%p274_p3), %s186_s26, 128  }
  0x59   : > { %417 = vsyncadd (!%p274_p3), %s186_s26, 4294967168  ;;  %s17_s11 = sadd.s32 1, %s440_s11   ;;  %s639_s6 = smov %s424_s7 }
  0x5a   : > { %p14_p6 = scmp.ge.s32.totalorder %s17_s11, 4   ;;  %s640_s7 = smov %s428_s8 }
  0x5b   : > { %s641_s8 = smov %s510_s20  ;;  %s642_s9 = smov %s436_s10 }
  0x5c   : > { %s643_s10 = smov %s645_s14  ;;  %16 = sbr.rel (!%p14_p6) target bundleno = 6 (0x6), region = 73 }
  0x63   :  { %191 = vsyncpa [#allocation3], 1 }
  0x64   :  { %193 = vsyncpa [#allocation3 + $0x1], 1 }
  0x65   :  { %194 = vsyncpa [#allocation4], 1 }
  0x66   :  { %196 = vsyncpa [#allocation4 + $0x1], 1 }

</bundles_post_ra>
